<compile_context>
chip_gen: v6e
topology: v6e:2x2x1
jax: 0.10.0
libtpu: 0.0.40
codegen_flags: <defaults>
</compile_context>

<pallas_src>
from functools import partial

import jax
import jax.numpy as jnp
from jax.experimental import pallas as pl
from jax.experimental.pallas import tpu as pltpu


# ---------------------------------------------------------------------------
# Pallas kernels: Linear GP covariance (MXU path) + diag path
# ---------------------------------------------------------------------------

def _dot_product_kernel(x_ref, z_ref, o_ref):
    """o[b, t, s] = sum_d x[b, t, d] * z[b, s, d]   (batched MXU matmul).

    x_ref: (bb, T,  D) VMEM tile
    z_ref: (bb, Tz, D) VMEM tile
    o_ref: (bb, T, Tz) VMEM tile
    """
    o_ref[...] = jnp.einsum(
        "btd,bsd->bts", x_ref[...], z_ref[...],
        preferred_element_type=jnp.float32,
    ).astype(o_ref.dtype)


def _diag_dot_kernel(x_ref, o_ref):
    """o[b, t] = sum_d x[b, t, d]^2."""
    x = x_ref[...].astype(jnp.float32)
    o_ref[...] = jnp.sum(x * x, axis=-1).astype(o_ref.dtype)


def _largest_divisor_leq(n, cap):
    cap = max(1, min(n, cap))
    best = 1
    for d in range(1, n + 1):
        if n % d == 0 and d <= cap:
            best = d
    return best


# ~6 MiB of live (double-buffered) block data per pallas_call step: comfortably
# inside the default scoped VMEM on v5e (16 MiB) and v6e/v7x (32 MiB).
_VMEM_BLOCK_BUDGET = 6 << 20


def _batched_dot_pallas(Xs, Zs):
    """Xs: (K, N, T, D), Zs: (K, N, Tz, D) -> (K, N, T, Tz)."""
    K, N, T, D = Xs.shape
    Tz = Zs.shape[2]
    B = K * N
    x = Xs.reshape(B, T, D)
    z = Zs.reshape(B, Tz, D)

    itemsize = jnp.dtype(Xs.dtype).itemsize
    per_elem = 2 * itemsize * (T * D + Tz * D + T * Tz)  # x2: double buffering
    bb = _largest_divisor_leq(B, _VMEM_BLOCK_BUDGET // max(per_elem, 1))

    out = pl.pallas_call(
        _dot_product_kernel,
        out_shape=jax.ShapeDtypeStruct((B, T, Tz), Xs.dtype),
        grid=(B // bb,),
        in_specs=[
            pl.BlockSpec((bb, T, D), lambda b: (b, 0, 0)),
            pl.BlockSpec((bb, Tz, D), lambda b: (b, 0, 0)),
        ],
        out_specs=pl.BlockSpec((bb, T, Tz), lambda b: (b, 0, 0)),
        compiler_params=pltpu.CompilerParams(
            dimension_semantics=("parallel",)),
    )(x, z)
    return out.reshape(K, N, T, Tz)


def _diag_dot_pallas(Xs):
    """Xs: (K, N, T, D) -> (K, N, T)."""
    K, N, T, D = Xs.shape
    B = K * N
    x = Xs.reshape(B, T, D)

    itemsize = jnp.dtype(Xs.dtype).itemsize
    per_elem = 2 * itemsize * (T * D + T)
    cap = _VMEM_BLOCK_BUDGET // max(per_elem, 1)
    if B <= cap:
        bb = B  # full-extent block: output block equals full array dims
    elif B % 8 == 0:
        # output block (bb, T): keep bb a multiple of 8 (sublane constraint)
        bb = 8 * _largest_divisor_leq(B // 8, max(cap // 8, 1))
    else:
        bb = B

    out = pl.pallas_call(
        _diag_dot_kernel,
        out_shape=jax.ShapeDtypeStruct((B, T), Xs.dtype),
        grid=(B // bb,),
        in_specs=[pl.BlockSpec((bb, T, D), lambda b: (b, 0, 0))],
        out_specs=pl.BlockSpec((bb, T), lambda b: (b, 0)),
        compiler_params=pltpu.CompilerParams(
            dimension_semantics=("parallel",)),
    )(x)
    return out.reshape(K, N, T)


# ---------------------------------------------------------------------------
# Elementwise link functions (lf / lf_inv)
# ---------------------------------------------------------------------------

_EW_LANES = 1024        # lane dim, multiple of 128
_EW_BLOCK_ROWS = 256    # sublane dim per block, multiple of 8 (1 MiB f32 per block)
_EW_SMALL = 1 << 14     # below this a kernel launch costs more than it saves


def _ew_math(x, op):
    x = x.astype(jnp.float32)  # keep math in f32 (v5e has no bf16 VPU/EUP path)
    if op == "exp":
        return jnp.exp(x)
    if op == "log":
        return jnp.log(x)
    if op == "softplus":
        return jax.nn.softplus(x)
    if op == "softplus_inv":
        # torch.where(x > 30, x, log(exp(x) - 1)); expm1 avoids cancellation
        return jnp.where(x > 30.0, x, jnp.log(jnp.expm1(jnp.minimum(x, 30.0))))
    if op == "relu":
        return jnp.maximum(x, 0.0)
    if op == "identity":
        return x
    raise NotImplementedError("Link function is not supported.")


def _ew_kernel(x_ref, o_ref, *, op):
    o_ref[...] = _ew_math(x_ref[...], op).astype(o_ref.dtype)


def _elementwise(op, x):
    x = jnp.asarray(x)
    if op == "identity":
        return x
    if x.size <= _EW_SMALL:
        # Tiny hyperparameter vectors: inline XLA beats a Pallas launch.
        return _ew_math(x, op).astype(x.dtype).reshape(x.shape)

    orig_shape = x.shape
    flat = x.reshape(-1)
    n = flat.shape[0]
    rows = -(-n // _EW_LANES)
    rows_padded = -(-rows // _EW_BLOCK_ROWS) * _EW_BLOCK_ROWS
    total = rows_padded * _EW_LANES
    if total != n:
        # pad with 1.0 so log / softplus_inv stay finite on the padded tail
        flat = jnp.concatenate([flat, jnp.ones((total - n,), dtype=x.dtype)])
    tiled = flat.reshape(rows_padded, _EW_LANES)

    out = pl.pallas_call(
        partial(_ew_kernel, op=op),
        out_shape=jax.ShapeDtypeStruct((rows_padded, _EW_LANES), x.dtype),
        grid=(rows_padded // _EW_BLOCK_ROWS,),
        in_specs=[pl.BlockSpec((_EW_BLOCK_ROWS, _EW_LANES), lambda r: (r, 0))],
        out_specs=pl.BlockSpec((_EW_BLOCK_ROWS, _EW_LANES), lambda r: (r, 0)),
        compiler_params=pltpu.CompilerParams(
            dimension_semantics=("parallel",)),
    )(tiled)
    return out.reshape(-1)[:n].reshape(orig_shape)


# ---------------------------------------------------------------------------
# Module wrappers mirroring the PyTorch classes
# ---------------------------------------------------------------------------

class Kernel:
    """Base class for multi-lengthscale GP kernels (Pallas/JAX port)."""

    def __init__(self, input_dims, track_dims=None, f="exp", tensor_type=jnp.float32):
        self.tensor_type = tensor_type
        if track_dims is None:
            track_dims = list(range(input_dims))
        elif input_dims != len(track_dims):
            raise ValueError("Input size and the length of active dimensionals should be equal.")
        self.input_dims = input_dims
        self.track_dims = track_dims

        if f == "exp":
            self.lf = lambda x: _elementwise("exp", x)
            self.lf_inv = lambda x: _elementwise("log", x)
        elif f == "softplus":
            self.lf = lambda x: _elementwise("softplus", x)
            self.lf_inv = lambda x: _elementwise("softplus_inv", x)
        elif f == "relu":
            self.lf = lambda x: _elementwise("relu", x)
            self.lf_inv = lambda x: _elementwise("identity", x)
        else:
            raise NotImplementedError("Link function is not supported.")

    def forward(self, X, Z=None, diag=False):
        raise NotImplementedError

    def __call__(self, X, Z=None, diag=False):
        return self.forward(X, Z, diag)

    def sample_spectral_density(self, samples):
        # TODO(synk): abstract in the reference module; spectral densities live in subclasses.
        raise NotImplementedError

    def _slice_input(self, X):
        # Static track_dims gather is pure layout (no compute) -> leave to XLA;
        # the Pallas kernels consume the lane-contiguous sliced arrays.
        if X.ndim == 4:
            return X[..., jnp.asarray(self.track_dims)]
        raise ValueError("Input X must be of shape (K x N x T x D).")

    def _XZ(self, X, Z=None):
        if Z is None:
            Z = X
        X = self._slice_input(X)
        Z = self._slice_input(Z)
        if X.shape[-1] != Z.shape[-1]:
            raise ValueError("Inputs must have the same number of features.")
        return X, Z


class DotProduct(Kernel):
    """Base class for kernels which are functions of x . z."""

    def _dot_product(self, X, Z=None, diag=False):
        if diag:
            return _diag_dot_pallas(self._slice_input(X))
        if Z is None:
            Z = X
        Xs = self._slice_input(X)
        Zs = self._slice_input(Z)
        if Xs.shape[-1] != Zs.shape[-1]:
            raise ValueError("Inputs must have the same number of features.")
        return _batched_dot_pallas(Xs, Zs)


class Linear(DotProduct):
    """k(x, z) = x . z (homogeneous linear kernel)."""

    def forward(self, X, Z=None, diag=False):
        return self._dot_product(X, Z, diag)


# ---------------------------------------------------------------------------
# Demo / self-test
# ---------------------------------------------------------------------------

if __name__ == "__main__":
    key = jax.random.PRNGKey(0)
    k1, k2, k3 = jax.random.split(key, 3)

    # X: (samples K=2, neurons N=4, timesteps T=16, dims D=8); Z with Tz=8.
    K, N, T, Tz, D = 2, 4, 16, 8, 8
    X = jax.random.normal(k1, (K, N, T, D), dtype=jnp.float32)
    Z = jax.random.normal(k2, (K, N, Tz, D), dtype=jnp.float32)

    track_dims = [0, 2, 5, 7]
    kern = Linear(input_dims=len(track_dims), track_dims=track_dims, f="exp")
    idx = jnp.asarray(track_dims)
    hi = jax.lax.Precision.HIGHEST

    # full covariance k(X, Z)
    Kxz = jax.block_until_ready(kern(X, Z))
    ref = jnp.einsum("knqd,knsd->knqs", X[..., idx], Z[..., idx], precision=hi)
    assert Kxz.shape == (K, N, T, Tz)
    assert jnp.allclose(Kxz, ref, rtol=1e-5, atol=1e-5)

    # Z=None path -> k(X, X)
    Kxx = jax.block_until_ready(kern(X))
    refxx = jnp.einsum("knqd,knsd->knqs", X[..., idx], X[..., idx], precision=hi)
    assert jnp.allclose(Kxx, refxx, rtol=1e-5, atol=1e-5)

    # diag path
    Kd = jax.block_until_ready(kern(X, diag=True))
    refd = jnp.sum(X[..., idx] ** 2, axis=-1)
    assert Kd.shape == (K, N, T)
    assert jnp.allclose(Kd, refd, rtol=1e-5, atol=1e-5)

    # link functions: tiny hyperparameter vector -> inline fast path
    raw = jnp.linspace(-1.0, 1.0, len(track_dims)).astype(jnp.float32)
    pos = jax.block_until_ready(kern.lf(raw))
    assert jnp.allclose(pos, jnp.exp(raw), rtol=1e-6)
    back = jax.block_until_ready(kern.lf_inv(pos))
    assert jnp.allclose(back, raw, rtol=1e-5, atol=1e-5)

    # link functions: large array -> tiled Pallas elementwise path (exercises padding)
    big = jax.random.normal(k3, (513, 700), dtype=jnp.float32)
    kern_sp = Linear(input_dims=len(track_dims), track_dims=track_dims, f="softplus")
    sp = jax.block_until_ready(kern_sp.lf(big))
    assert jnp.allclose(sp, jax.nn.softplus(big), rtol=1e-5, atol=1e-6)
    rt = jax.block_until_ready(kern_sp.lf_inv(sp))
    assert jnp.allclose(rt, big, rtol=1e-4, atol=1e-4)

    print("KERNEL_OK")
</pallas_src>

<mosaic_0001>
module attributes {stable_mosaic.version = 11 : i64} {
  func.func @_dot_product_kernel(%arg0: i32, %arg1: memref<8x16x4xf32, #tpu.memory_space<vmem>>, %arg2: memref<8x8x4xf32, #tpu.memory_space<vmem>>, %arg3: memref<8x16x8xf32, #tpu.memory_space<vmem>>) attributes {dimension_semantics = [#tpu.dimension_semantics<parallel>], iteration_bounds = array<i64: 1>, scalar_prefetch = 0 : i64, scratch_operands = 0 : i64, tpu.core_type = #tpu.core_type<tc>, window_params = [{transform_indices = @transform_0, window_bounds = array<i64: 8, 16, 4>}, {transform_indices = @transform_1, window_bounds = array<i64: 8, 8, 4>}, {transform_indices = @transform_2, window_bounds = array<i64: 8, 16, 8>}]} {
    %c0 = arith.constant 0 : index
    %c0_0 = arith.constant 0 : index
    %c0_1 = arith.constant 0 : index
    %0 = vector.load %arg1[%c0, %c0_0, %c0_1] : memref<8x16x4xf32, #tpu.memory_space<vmem>>, vector<8x16x4xf32>
    %c0_2 = arith.constant 0 : index
    %c0_3 = arith.constant 0 : index
    %c0_4 = arith.constant 0 : index
    %1 = vector.load %arg2[%c0_2, %c0_3, %c0_4] : memref<8x8x4xf32, #tpu.memory_space<vmem>>, vector<8x8x4xf32>
    "tpu.trace_start"() <{level = 10 : i32, message = "btd,bsd->bts"}> : () -> ()
    %cst = arith.constant dense<0.000000e+00> : vector<8x16x8xf32>
    %2 = tpu.matmul %0, %1, %cst {dimension_numbers = #tpu.dot_dimension_numbers<[2], [2], [1], [1], [0, 0, 0, 1, 1, 1], [0], [0]>} : vector<8x16x4xf32>, vector<8x8x4xf32>, vector<8x16x8xf32> -> vector<8x16x8xf32>
    "tpu.trace_stop"() : () -> ()
    %c0_5 = arith.constant 0 : index
    %c0_6 = arith.constant 0 : index
    %c0_7 = arith.constant 0 : index
    %3 = vector.load %arg3[%c0_5, %c0_6, %c0_7] : memref<8x16x8xf32, #tpu.memory_space<vmem>>, vector<8x16x8xf32>
    tpu.vector_store %arg3[%c0_5, %c0_6, %c0_7], %2 {strides = array<i32>} : memref<8x16x8xf32, #tpu.memory_space<vmem>>, vector<8x16x8xf32>,
    return
  }
  func.func @transform_0(%arg0: i32) -> (i32, i32, i32) {
    %c0_i32 = arith.constant 0 : i32
    %c0_i32_0 = arith.constant 0 : i32
    %c0_i32_1 = arith.constant 0 : i32
    return %arg0, %c0_i32, %c0_i32_0 : i32, i32, i32
  }
  func.func @transform_1(%arg0: i32) -> (i32, i32, i32) {
    %c0_i32 = arith.constant 0 : i32
    %c0_i32_0 = arith.constant 0 : i32
    %c0_i32_1 = arith.constant 0 : i32
    return %arg0, %c0_i32, %c0_i32_0 : i32, i32, i32
  }
  func.func @transform_2(%arg0: i32) -> (i32, i32, i32) {
    %c0_i32 = arith.constant 0 : i32
    %c0_i32_0 = arith.constant 0 : i32
    %c0_i32_1 = arith.constant 0 : i32
    return %arg0, %c0_i32, %c0_i32_0 : i32, i32, i32
  }
}

</mosaic_0001>

<bundles_post_ra>
// kernel: tpu_custom_call.1
= control target key start
LH: loop header
LB: loop body
LE: loop exit
PB: predicated region body
PF: predicated region fallthrough
CT: control target
= control target key end

     0   :  { %vm35_vm0 = vcmask 31744   ;;  %vm708_vm1 = vcmask 64512   ;;  %s1000_s1 = inlined_call_operand.vmem [shape: f32[8,8,4], index: 1, kind: input, shape index: {}]   ;;  %s1001_s0 = inlined_call_operand.vmem [shape: f32[8,16,4], index: 0, kind: input, shape index: {}]   ;;  %s1002_s2 = inlined_call_operand.vmem [shape: f32[8,16,8], index: 2, kind: output, shape index: {}]  }
   0x1   :  { %v27_v0 = vld [vmem:[%s1000_s1] sm:$0xff]  ;;  %v28_v1 = vld [vmem:[%s1000_s1 + $0x8] sm:$0xff]  ;;  %v13_v3 = vld [vmem:[%s1001_s0 + $0x10] sm:$0xff] }
   0x2   :  { %v11_v2 = vld [vmem:[%s1001_s0] sm:$0xff]  ;;  %777 = vmatprep.subr.msk.mxu0 %vm35_vm0, %v27_v0  ;;  %782 = vmatprep.subr.msk.mxu1 %vm35_vm0, %v28_v1  ;;  %v12_v4 = vld [vmem:[%s1001_s0 + $0x8] sm:$0xff]  ;;  %v14_v5 = vld [vmem:[%s1001_s0 + $0x18] sm:$0xff] }
   0x3   :  { %778 = vmatpush3.xpose.msk.msra.mxu0 %vm35_vm0, %v27_v0  ;;  %783 = vmatpush3.xpose.msk.msra.mxu1 %vm35_vm0, %v28_v1  ;;  %v29_v6 = vld [vmem:[%s1000_s1 + $0x10] sm:$0xff]  ;;  %v30_v7 = vld [vmem:[%s1000_s1 + $0x18] sm:$0xff]  ;;  %v15_v8 = vld [vmem:[%s1001_s0 + $0x20] sm:$0xff] }
   0x4   :  { %779 = vmatprep.mubr.msk.f32.mxu0 %vm35_vm0, %v11_v2  ;;  %784 = vmatprep.mubr.msk.f32.mxu1 %vm35_vm0, %v13_v3  ;;  %v17_v9 = vld [vmem:[%s1001_s0 + $0x30] sm:$0xff]  ;;  %v31_v10 = vld [vmem:[%s1000_s1 + $0x20] sm:$0xff]  ;;  %v32_v11 = vld [vmem:[%s1000_s1 + $0x28] sm:$0xff] }
   0x5   :  { %787 = vmatprep.subr.msk.mxu0 %vm35_vm0, %v29_v6  ;;  %792 = vmatprep.subr.msk.mxu1 %vm35_vm0, %v30_v7  ;;  %v16_v12 = vld [vmem:[%s1001_s0 + $0x28] sm:$0xff]  ;;  %v18_v13 = vld [vmem:[%s1001_s0 + $0x38] sm:$0xff]  ;;  %v19_v14 = vld [vmem:[%s1001_s0 + $0x40] sm:$0xff] }
   0x6   :  { %780 = vmatmul.mubr.msk.f32.vlgmr.msra.gmra.mxu0 %vm35_vm0, %v12_v4  ;;  %785 = vmatmul.mubr.msk.f32.vlgmr.msra.gmra.mxu1 %vm35_vm0, %v14_v5  ;;  %v21_v15 = vld [vmem:[%s1001_s0 + $0x50] sm:$0xff]  ;;  %v34_v17 = vld [vmem:[%s1000_s1 + $0x38] sm:$0xff]  ;;  %v20_v18 = vld [vmem:[%s1001_s0 + $0x48] sm:$0xff] }
   0x7   :  { %788 = vmatpush3.xpose.msk.msra.mxu0 %vm35_vm0, %v29_v6  ;;  %793 = vmatpush3.xpose.msk.msra.mxu1 %vm35_vm0, %v30_v7  ;;  %v33_v16 = vld [vmem:[%s1000_s1 + $0x30] sm:$0xff]  ;;  %v22_v19 = vld [vmem:[%s1001_s0 + $0x58] sm:$0xff]  ;;  %v23_v20 = vld [vmem:[%s1001_s0 + $0x60] sm:$0xff] }
   0x8   :  { %789 = vmatprep.mubr.msk.f32.mxu0 %vm35_vm0, %v15_v8  ;;  %794 = vmatprep.mubr.msk.f32.mxu1 %vm35_vm0, %v17_v9  ;;  %v25_v21 = vld [vmem:[%s1001_s0 + $0x70] sm:$0xff]  ;;  %v24_v22 = vld [vmem:[%s1001_s0 + $0x68] sm:$0xff]  ;;  %v26_v23 = vld [vmem:[%s1001_s0 + $0x78] sm:$0xff] }
   0x9   :  { %797 = vmatprep.subr.msk.mxu0 %vm35_vm0, %v31_v10  ;;  %802 = vmatprep.subr.msk.mxu1 %vm35_vm0, %v32_v11 }
   0xa   :  { %790 = vmatmul.mubr.msk.f32.vlgmr.msra.gmra.mxu0 %vm35_vm0, %v16_v12  ;;  %795 = vmatmul.mubr.msk.f32.vlgmr.msra.gmra.mxu1 %vm35_vm0, %v18_v13 }
   0xb   :  { %798 = vmatpush3.xpose.msk.msra.mxu0 %vm35_vm0, %v31_v10  ;;  %803 = vmatpush3.xpose.msk.msra.mxu1 %vm35_vm0, %v32_v11 }
   0xc   :  { %799 = vmatprep.mubr.msk.f32.mxu0 %vm35_vm0, %v19_v14  ;;  %804 = vmatprep.mubr.msk.f32.mxu1 %vm35_vm0, %v21_v15 }
   0xd   :  { %807 = vmatprep.subr.msk.mxu0 %vm35_vm0, %v33_v16  ;;  %812 = vmatprep.subr.msk.mxu1 %vm35_vm0, %v34_v17 }
   0xe   :  { %800 = vmatmul.mubr.msk.f32.vlgmr.msra.gmra.mxu0 %vm35_vm0, %v20_v18  ;;  %805 = vmatmul.mubr.msk.f32.vlgmr.msra.gmra.mxu1 %vm35_vm0, %v22_v19 }
   0xf   :  { %808 = vmatpush3.xpose.msk.msra.mxu0 %vm35_vm0, %v33_v16  ;;  %813 = vmatpush3.xpose.msk.msra.mxu1 %vm35_vm0, %v34_v17 }
  0x10   :  { %809 = vmatprep.mubr.msk.f32.mxu0 %vm35_vm0, %v23_v20  ;;  %814 = vmatprep.mubr.msk.f32.mxu1 %vm35_vm0, %v25_v21 }
  0x12   :  { %810 = vmatmul.mubr.msk.f32.vlgmr.msra.gmra.mxu0 %vm35_vm0, %v24_v22  ;;  %815 = vmatmul.mubr.msk.f32.vlgmr.msra.gmra.mxu1 %vm35_vm0, %v26_v23 }
  0xc6   :  { %v781_v24 = vpop.f32.mrf.mxu0  ;;  %v786_v25 = vpop.f32.mrf.mxu1 }
  0xc7   :  { %710 = vst.msk [vmem:[%s1002_s2 + $0x8] sm:$0xff] %vm708_vm1, %v781_v24  ;;  %712 = vst.msk [vmem:[%s1002_s2 + $0x18] sm:$0xff] %vm708_vm1, %v786_v25 }
  0xc8   :  { %v111_v26 = vpop.f32.mrf.mxu0  ;;  %v195_v27 = vpop.f32.mrf.mxu1 }
  0xc9   :  { %709 = vst.msk [vmem:[%s1002_s2] sm:$0xff] %vm708_vm1, %v111_v26  ;;  %711 = vst.msk [vmem:[%s1002_s2 + $0x10] sm:$0xff] %vm708_vm1, %v195_v27 }
  0xca   :  { %v791_v28 = vpop.f32.mrf.mxu0  ;;  %v796_v29 = vpop.f32.mrf.mxu1 }
  0xcb   :  { %714 = vst.msk [vmem:[%s1002_s2 + $0x28] sm:$0xff] %vm708_vm1, %v791_v28  ;;  %716 = vst.msk [vmem:[%s1002_s2 + $0x38] sm:$0xff] %vm708_vm1, %v796_v29 }
  0xcc   :  { %v279_v30 = vpop.f32.mrf.mxu0  ;;  %v363_v31 = vpop.f32.mrf.mxu1 }
  0xcd   :  { %713 = vst.msk [vmem:[%s1002_s2 + $0x20] sm:$0xff] %vm708_vm1, %v279_v30  ;;  %715 = vst.msk [vmem:[%s1002_s2 + $0x30] sm:$0xff] %vm708_vm1, %v363_v31 }
  0xce   :  { %v801_v32 = vpop.f32.mrf.mxu0  ;;  %v806_v33 = vpop.f32.mrf.mxu1 }
  0xcf   :  { %718 = vst.msk [vmem:[%s1002_s2 + $0x48] sm:$0xff] %vm708_vm1, %v801_v32  ;;  %720 = vst.msk [vmem:[%s1002_s2 + $0x58] sm:$0xff] %vm708_vm1, %v806_v33 }
  0xd0   :  { %v447_v34 = vpop.f32.mrf.mxu0  ;;  %v531_v35 = vpop.f32.mrf.mxu1 }
  0xd1   :  { %717 = vst.msk [vmem:[%s1002_s2 + $0x40] sm:$0xff] %vm708_vm1, %v447_v34  ;;  %719 = vst.msk [vmem:[%s1002_s2 + $0x50] sm:$0xff] %vm708_vm1, %v531_v35 }
  0xd2   :  { %v811_v36 = vpop.f32.mrf.mxu0  ;;  %v816_v37 = vpop.f32.mrf.mxu1 }
  0xd3   :  { %722 = vst.msk [vmem:[%s1002_s2 + $0x68] sm:$0xff] %vm708_vm1, %v811_v36  ;;  %724 = vst.msk [vmem:[%s1002_s2 + $0x78] sm:$0xff] %vm708_vm1, %v816_v37 }
  0xd4   :  { %v615_v38 = vpop.f32.mrf.mxu0  ;;  %v699_v39 = vpop.f32.mrf.mxu1 }
  0xd5   :  { %721 = vst.msk [vmem:[%s1002_s2 + $0x60] sm:$0xff] %vm708_vm1, %v615_v38  ;;  %723 = vst.msk [vmem:[%s1002_s2 + $0x70] sm:$0xff] %vm708_vm1, %v699_v39 }

</bundles_post_ra>
